<compile_context>
chip_gen: v6e
topology: v6e:2x2x1
jax: 0.10.0
libtpu: 0.0.40
codegen_flags: <defaults>
</compile_context>

<pallas_src>
import jax
import jax.numpy as jnp
from jax.experimental import pallas as pl
from jax.experimental.pallas import tpu as pltpu


# ------------------------------ helpers ------------------------------------ #

def _round_up(a, b):
    return ((a + b - 1) // b) * b


def _vmem_capacity_bytes():
    try:
        return int(pltpu.get_tpu_info().vmem_capacity_bytes)
    except Exception:
        return 128 * 1024 * 1024


def _pick_token_tile(vmem_cap, total_tokens):
    # v7x-class parts have 64 MiB per-TC VMEM -> smaller token tile.
    target = 384 if vmem_cap <= 80 * 1024 * 1024 else 512
    return max(16, min(target, _round_up(total_tokens, 16)))


def _pick_intermediate_tile(intermediate, vmem_cap):
    """Returns (ti, padded_intermediate).  Always tiles cleanly (pads I if needed)."""
    cap = 256 if vmem_cap <= 80 * 1024 * 1024 else 512
    if intermediate <= cap:
        return intermediate, intermediate
    ti = (cap // 128) * 128
    return ti, _round_up(intermediate, ti)


def _vmem_limit_bytes(tm, ti, hidden, vmem_cap):
    bf16, f32 = 2, 4
    x_tile = tm * hidden * bf16
    w_tiles = (hidden * 2 * ti + ti * hidden) * bf16     # fused gate|up + down
    coef_tile = tm * f32
    out_tile = tm * hidden * bf16
    acc_tile = tm * hidden * f32                          # single-buffered scratch
    est = 2 * (x_tile + w_tiles + coef_tile + out_tile) + acc_tile
    est = int(est * 1.3)                                  # slack
    return min(max(32 * 1024 * 1024, est), vmem_cap)


# ----------------------------- Pallas kernels ------------------------------- #

def _make_dense_expert_kernel(ti, scale):
    """Dense shared-expert pass.  grid = (token_tiles, shared_experts, i_tiles)."""

    def kernel(x_ref, wgu_ref, wd_ref, o_ref, acc_ref):
        e, it = pl.program_id(1), pl.program_id(2)
        first = (e == 0) & (it == 0)
        last = (e == pl.num_programs(1) - 1) & (it == pl.num_programs(2) - 1)

        x = x_ref[...]                                                    # (tm, H) bf16
        gu = jnp.dot(x, wgu_ref[0], preferred_element_type=jnp.float32)  # (tm, 2*ti)
        g, u = gu[:, :ti], gu[:, ti:]
        h = (g * jax.nn.sigmoid(g)) * u                                   # SiLU(g)*u
        if scale != 1.0:
            h = h * scale
        contrib = jnp.dot(h.astype(wd_ref.dtype), wd_ref[0],
                          preferred_element_type=jnp.float32)             # (tm, H)

        @pl.when(first)
        def _():
            acc_ref[...] = contrib

        @pl.when(jnp.logical_not(first))
        def _():
            acc_ref[...] += contrib

        @pl.when(last)
        def _():
            o_ref[...] = acc_ref[...].astype(o_ref.dtype)

    return kernel


def _make_grouped_expert_kernel(ti):
    """Token-grouped routed-expert pass.  grid = (token_tiles, i_tiles); each
    token tile belongs to exactly one routed expert (via scalar-prefetched
    tile_expert used by the weight index_maps)."""

    def kernel(tile_expert_ref, x_ref, wgu_ref, wd_ref, coef_ref, o_ref, acc_ref):
        del tile_expert_ref  # consumed by the weight index_maps
        it = pl.program_id(1)
        first = it == 0
        last = it == pl.num_programs(1) - 1

        x = x_ref[...]                                                    # (tm, H) bf16
        gu = jnp.dot(x, wgu_ref[0], preferred_element_type=jnp.float32)  # (tm, 2*ti)
        g, u = gu[:, :ti], gu[:, ti:]
        # SiLU(g) * u, scaled by routing coef *before* the down projection.
        h = (g * jax.nn.sigmoid(g)) * u * coef_ref[...]                   # (tm, ti) f32
        contrib = jnp.dot(h.astype(wd_ref.dtype), wd_ref[0],
                          preferred_element_type=jnp.float32)             # (tm, H)

        @pl.when(first)
        def _():
            acc_ref[...] = contrib

        @pl.when(jnp.logical_not(first))
        def _():
            acc_ref[...] += contrib

        @pl.when(last)
        def _():
            o_ref[...] = acc_ref[...].astype(o_ref.dtype)

    return kernel


# --------------------------- pallas_call wrappers --------------------------- #

def shared_experts_dense(x_pad, wgu_sh, wd_sh, *, tm, ti, scale, vmem_cap):
    T_pad, H = x_pad.shape
    n_sh = wgu_sh.shape[0]
    n_i = wd_sh.shape[1] // ti
    return pl.pallas_call(
        _make_dense_expert_kernel(ti, scale),
        out_shape=jax.ShapeDtypeStruct((T_pad, H), jnp.bfloat16),
        grid_spec=pltpu.PrefetchScalarGridSpec(
            num_scalar_prefetch=0,
            grid=(T_pad // tm, n_sh, n_i),
            in_specs=[
                pl.BlockSpec((tm, H), lambda i, e, it: (i, 0)),
                pl.BlockSpec((1, H, 2 * ti), lambda i, e, it: (e, 0, it)),
                pl.BlockSpec((1, ti, H), lambda i, e, it: (e, it, 0)),
            ],
            out_specs=pl.BlockSpec((tm, H), lambda i, e, it: (i, 0)),
            scratch_shapes=[pltpu.VMEM((tm, H), jnp.float32)],
        ),
        compiler_params=pltpu.CompilerParams(
            dimension_semantics=("parallel", "arbitrary", "arbitrary"),
            vmem_limit_bytes=_vmem_limit_bytes(tm, ti, H, vmem_cap),
        ),
    )(x_pad, wgu_sh, wd_sh)


def routed_experts_grouped(tile_expert, x_exp, wgu_rt, wd_rt, coef, *, tm, ti,
                           vmem_cap):
    R, H = x_exp.shape
    n_i = wd_rt.shape[1] // ti
    return pl.pallas_call(
        _make_grouped_expert_kernel(ti),
        out_shape=jax.ShapeDtypeStruct((R, H), jnp.bfloat16),
        grid_spec=pltpu.PrefetchScalarGridSpec(
            num_scalar_prefetch=1,
            grid=(R // tm, n_i),
            in_specs=[
                pl.BlockSpec((tm, H), lambda t, it, te: (t, 0)),
                pl.BlockSpec((1, H, 2 * ti), lambda t, it, te: (te[t], 0, it)),
                pl.BlockSpec((1, ti, H), lambda t, it, te: (te[t], it, 0)),
                pl.BlockSpec((tm, 1), lambda t, it, te: (t, 0)),
            ],
            out_specs=pl.BlockSpec((tm, H), lambda t, it, te: (t, 0)),
            scratch_shapes=[pltpu.VMEM((tm, H), jnp.float32)],
        ),
        compiler_params=pltpu.CompilerParams(
            dimension_semantics=("parallel", "arbitrary"),
            vmem_limit_bytes=_vmem_limit_bytes(tm, ti, H, vmem_cap),
        ),
    )(tile_expert, x_exp, wgu_rt, wd_rt, coef)


# ------------------------------ parameters ---------------------------------- #

def init_params(key, hidden_size, intermediate_size, num_experts=8,
                num_shared_experts=1):
    num_routed = num_experts - num_shared_experts
    k0, k1, k2, k3 = jax.random.split(key, 4)
    scale = 0.02
    wg = (jax.random.normal(k0, (num_experts, hidden_size, intermediate_size),
                            jnp.float32) * scale).astype(jnp.bfloat16)
    wu = (jax.random.normal(k1, (num_experts, hidden_size, intermediate_size),
                            jnp.float32) * scale).astype(jnp.bfloat16)
    wd = (jax.random.normal(k2, (num_experts, intermediate_size, hidden_size),
                            jnp.float32) * scale).astype(jnp.bfloat16)
    w_router = jax.random.normal(k3, (hidden_size, num_routed),
                                 jnp.float32) * scale
    routing_bias = jnp.zeros((num_routed,), jnp.float32)
    return dict(wg=wg, wu=wu, wd=wd, w_router=w_router,
                routing_bias=routing_bias)


# ------------------------------ forward pass -------------------------------- #

def deepseek_moe_forward(params, x, *, top_k=2, num_shared_experts=1,
                         tm=None, ti=None):
    B, S, H = x.shape
    T = B * S
    x_f32 = x.reshape(T, H).astype(jnp.float32)
    wg, wu, wd = params["wg"], params["wu"], params["wd"]
    E, _, I = wg.shape
    num_routed = E - num_shared_experts

    vmem_cap = _vmem_capacity_bytes()
    if tm is None:
        tm = _pick_token_tile(vmem_cap, T)
    tm = max(16, _round_up(int(tm), 16))          # bf16 min sublane tile is (16, 128)
    if ti is None:
        ti, I_pad = _pick_intermediate_tile(I, vmem_cap)
    else:
        ti = int(ti)
        I_pad = _round_up(I, ti)
    n_i = I_pad // ti

    if I_pad != I:
        # Zero-padded intermediate channels contribute exactly 0 to the output.
        pad_i = I_pad - I
        wg = jnp.pad(wg, ((0, 0), (0, 0), (0, pad_i)))
        wu = jnp.pad(wu, ((0, 0), (0, 0), (0, pad_i)))
        wd = jnp.pad(wd, ((0, 0), (0, pad_i), (0, 0)))

    # Fused gate|up weight, interleaved per intermediate tile so that one
    # (1, H, 2*ti) block is exactly [gate tile it | up tile it].
    wgu = jnp.concatenate(
        [wg.reshape(E, H, n_i, ti), wu.reshape(E, H, n_i, ti)], axis=3
    ).reshape(E, H, 2 * I_pad)

    # Router + sigmoid + top-k: tiny (T, H) @ (H, R) with R = E - shared — kept
    # in plain XLA on purpose.
    # TODO(synk): top-k selection / sort have no clean Pallas primitive; done in JAX.
    logits = x_f32 @ params["w_router"] + params["routing_bias"]
    probs = jax.nn.sigmoid(logits)
    scores, indices = jax.lax.top_k(probs, top_k)                       # (T, k)
    scores = scores / jnp.sum(scores, axis=-1, keepdims=True)

    x_bf = x_f32.astype(jnp.bfloat16)

    # -------- shared experts: plain dense pass over all tokens --------
    T_pad = _round_up(T, tm)
    x_pad = jnp.pad(x_bf, ((0, T_pad - T), (0, 0))) if T_pad != T else x_bf
    shared_scale = (1.0 / num_shared_experts) if num_shared_experts > 1 else 1.0
    shared_out = shared_experts_dense(
        x_pad, wgu[:num_shared_experts], wd[:num_shared_experts],
        tm=tm, ti=ti, scale=shared_scale, vmem_cap=vmem_cap)            # (T_pad, H) bf16

    # -------- routed experts: token-grouped (sorted-by-expert) matmul --------
    N = T * top_k
    expert_flat = indices.reshape(N).astype(jnp.int32)
    coef_flat = scores.reshape(N).astype(jnp.float32)
    token_flat = jnp.repeat(jnp.arange(T, dtype=jnp.int32), top_k)

    order = jnp.argsort(expert_flat)
    s_expert = expert_flat[order]
    s_token = token_flat[order]
    s_coef = coef_flat[order]

    group_sizes = jnp.bincount(expert_flat, length=num_routed)          # (R,)
    padded_sizes = ((group_sizes + tm - 1) // tm) * tm                  # tile-aligned
    group_start = jnp.cumsum(group_sizes) - group_sizes                 # exclusive
    padded_start = jnp.cumsum(padded_sizes) - padded_sizes              # exclusive

    # Static worst-case expanded length (each nonzero group pads < tm rows).
    R_max = _round_up(N + num_routed * (tm - 1), tm)
    n_tiles = R_max // tm

    ranks = jnp.arange(N, dtype=jnp.int32) - group_start[s_expert]
    dest = (padded_start[s_expert] + ranks).astype(jnp.int32)

    # Padding slots keep token 0 / coef 0 -> their kernel output rows are exact 0.
    buf_token = jnp.zeros((R_max,), jnp.int32).at[dest].set(s_token)
    buf_coef = jnp.zeros((R_max,), jnp.float32).at[dest].set(s_coef)[:, None]

    boundaries = jnp.cumsum(padded_sizes)
    tile_start = jnp.arange(n_tiles, dtype=jnp.int32) * tm
    tile_expert = jnp.minimum(
        jnp.searchsorted(boundaries, tile_start, side="right"),
        num_routed - 1).astype(jnp.int32)

    x_exp = x_bf[buf_token]                                             # (R_max, H) bf16
    routed_out = routed_experts_grouped(
        tile_expert, x_exp, wgu[num_shared_experts:], wd[num_shared_experts:],
        buf_coef, tm=tm, ti=ti, vmem_cap=vmem_cap)                      # (R_max, H) bf16

    # Scatter-add expanded rows back to token order (plain XLA scatter).
    combined = jnp.zeros((T, H), jnp.float32).at[buf_token].add(
        routed_out.astype(jnp.float32))
    out = shared_out[:T].astype(jnp.float32) + combined
    return out.reshape(B, S, H)


# --------------------------- pure-JAX reference ----------------------------- #

def reference_forward(params, x, *, top_k=2, num_shared_experts=1):
    B, S, H = x.shape
    T = B * S
    xt = x.reshape(T, H).astype(jnp.float32)
    num_routed = params["w_router"].shape[1]
    wg = params["wg"].astype(jnp.float32)
    wu = params["wu"].astype(jnp.float32)
    wd = params["wd"].astype(jnp.float32)

    def expert(e, z):
        g = z @ wg[e]
        u = z @ wu[e]
        return (jax.nn.silu(g) * u) @ wd[e]

    shared = jnp.zeros_like(xt)
    for e in range(num_shared_experts):
        shared = shared + expert(e, xt)
    if num_shared_experts > 1:
        shared = shared / num_shared_experts

    logits = xt @ params["w_router"] + params["routing_bias"]
    probs = jax.nn.sigmoid(logits)
    scores, indices = jax.lax.top_k(probs, top_k)
    scores = scores / jnp.sum(scores, axis=-1, keepdims=True)

    combined = jnp.zeros_like(xt)
    for k in range(top_k):
        idx_k = indices[:, k]
        sc_k = scores[:, k:k + 1]
        for i in range(num_routed):
            mask = (idx_k == i)[:, None].astype(jnp.float32)
            y = expert(num_shared_experts + i, xt)
            combined = combined + mask * sc_k * y
    return (shared + combined).reshape(B, S, H)


# --------------------------------- main ------------------------------------ #

if __name__ == "__main__":
    hidden_size = 32
    intermediate_size = 64
    num_experts = 8
    num_shared_experts = 1
    top_k = 2
    batch, seq = 2, 8

    key = jax.random.PRNGKey(0)
    k_param, k_x = jax.random.split(key)
    params = init_params(k_param, hidden_size, intermediate_size,
                         num_experts=num_experts,
                         num_shared_experts=num_shared_experts)
    x = jax.random.normal(k_x, (batch, seq, hidden_size), jnp.float32)

    # tm=16 -> multiple routed token tiles at this toy size: exercises the
    # sorted-by-expert grouping, scalar-prefetched per-tile expert weight
    # selection, per-group tile padding and the scatter-add combine.
    out = deepseek_moe_forward(params, x, top_k=top_k,
                               num_shared_experts=num_shared_experts, tm=16)
    out = jax.block_until_ready(out)

    ref = jax.block_until_ready(
        reference_forward(params, x, top_k=top_k,
                          num_shared_experts=num_shared_experts))

    assert out.shape == (batch, seq, hidden_size)
    # bf16 activations / intermediates / outputs in the kernel vs f32 reference
    # math on the same (bf16-stored) weights -> loosened but meaningful tol.
    assert jnp.allclose(out, ref, atol=3e-4, rtol=2e-2), "mismatch vs reference"
    print("KERNEL_OK")
</pallas_src>

<mosaic_0001>
module attributes {stable_mosaic.version = 11 : i64} {
  func.func @kernel(%arg0: i32, %arg1: i32, %arg2: i32, %arg3: memref<16x32xbf16, #tpu.memory_space<vmem>>, %arg4: memref<1x32x128xbf16, #tpu.memory_space<vmem>>, %arg5: memref<1x64x32xbf16, #tpu.memory_space<vmem>>, %arg6: memref<16x32xbf16, #tpu.memory_space<vmem>>, %arg7: memref<16x32xf32, #tpu.memory_space<vmem>>) attributes {dimension_semantics = [#tpu.dimension_semantics<parallel>, #tpu.dimension_semantics<arbitrary>, #tpu.dimension_semantics<arbitrary>], iteration_bounds = array<i64: 1, 1, 1>, scalar_prefetch = 0 : i64, scratch_operands = 1 : i64, tpu.core_type = #tpu.core_type<tc>, window_params = [{transform_indices = @transform_0, window_bounds = array<i64: 16, 32>}, {transform_indices = @transform_1, window_bounds = array<i64: 1, 32, 128>}, {transform_indices = @transform_2, window_bounds = array<i64: 1, 64, 32>}, {transform_indices = @transform_3, window_bounds = array<i64: 16, 32>}]} {
    %c0_i32 = arith.constant 0 : i32
    %0 = arith.cmpi eq, %arg1, %c0_i32 : i32
    %c0_i32_0 = arith.constant 0 : i32
    %1 = arith.cmpi eq, %arg2, %c0_i32_0 : i32
    %2 = arith.andi %0, %1 : i1
    %c0_i32_1 = arith.constant 0 : i32
    %3 = arith.cmpi eq, %arg1, %c0_i32_1 : i32
    %c0_i32_2 = arith.constant 0 : i32
    %4 = arith.cmpi eq, %arg2, %c0_i32_2 : i32
    %5 = arith.andi %3, %4 : i1
    %c0 = arith.constant 0 : index
    %c0_3 = arith.constant 0 : index
    %6 = vector.load %arg3[%c0, %c0_3] : memref<16x32xbf16, #tpu.memory_space<vmem>>, vector<16x32xbf16>
    %c0_4 = arith.constant 0 : index
    %c0_5 = arith.constant 0 : index
    %c0_6 = arith.constant 0 : index
    %7 = vector.load %arg4[%c0_4, %c0_5, %c0_6] : memref<1x32x128xbf16, #tpu.memory_space<vmem>>, vector<1x32x128xbf16>
    %8 = vector.shape_cast %7 : vector<1x32x128xbf16> to vector<32x128xbf16>
    %cst = arith.constant dense<0.000000e+00> : vector<16x128xf32>
    %9 = tpu.matmul %6, %8, %cst {dimension_numbers = #tpu.dot_dimension_numbers<[1], [0], [0], [1], [0, 0, 1, 1], [], []>} : vector<16x32xbf16>, vector<32x128xbf16>, vector<16x128xf32> -> vector<16x128xf32>
    %10 = vector.extract_strided_slice %9 {offsets = [0, 0], sizes = [16, 64], strides = [1, 1]} : vector<16x128xf32> to vector<16x64xf32>
    %11 = vector.extract_strided_slice %9 {offsets = [0, 64], sizes = [16, 64], strides = [1, 1]} : vector<16x128xf32> to vector<16x64xf32>
    %12 = arith.negf %10 : vector<16x64xf32>
    %13 = math.exp %12 : vector<16x64xf32>
    %cst_7 = arith.constant 1.000000e+00 : f32
    %14 = vector.broadcast %cst_7 : f32 to vector<16x64xf32>
    %15 = arith.addf %14, %13 : vector<16x64xf32>
    %16 = arith.divf %14, %15 : vector<16x64xf32>
    %17 = arith.mulf %10, %16 : vector<16x64xf32>
    %18 = arith.mulf %17, %11 : vector<16x64xf32>
    %19 = arith.truncf %18 : vector<16x64xf32> to vector<16x64xbf16>
    %c0_8 = arith.constant 0 : index
    %c0_9 = arith.constant 0 : index
    %c0_10 = arith.constant 0 : index
    %20 = vector.load %arg5[%c0_8, %c0_9, %c0_10] : memref<1x64x32xbf16, #tpu.memory_space<vmem>>, vector<1x64x32xbf16>
    %21 = vector.shape_cast %20 : vector<1x64x32xbf16> to vector<64x32xbf16>
    %cst_11 = arith.constant dense<0.000000e+00> : vector<16x32xf32>
    %22 = tpu.matmul %19, %21, %cst_11 {dimension_numbers = #tpu.dot_dimension_numbers<[1], [0], [0], [1], [0, 0, 1, 1], [], []>} : vector<16x64xbf16>, vector<64x32xbf16>, vector<16x32xf32> -> vector<16x32xf32>
    %23 = arith.extui %2 : i1 to i32
    %c0_i32_12 = arith.constant 0 : i32
    %24 = arith.cmpi ne, %23, %c0_i32_12 : i32
    scf.if %24 {
      %c0_15 = arith.constant 0 : index
      %c0_16 = arith.constant 0 : index
      %30 = vector.load %arg7[%c0_15, %c0_16] : memref<16x32xf32, #tpu.memory_space<vmem>>, vector<16x32xf32>
      tpu.vector_store %arg7[%c0_15, %c0_16], %22 {strides = array<i32>} : memref<16x32xf32, #tpu.memory_space<vmem>>, vector<16x32xf32>,
    } else {
    }
    %true = arith.constant true
    %25 = arith.xori %2, %true : i1
    %26 = arith.extui %25 : i1 to i32
    %c0_i32_13 = arith.constant 0 : i32
    %27 = arith.cmpi ne, %26, %c0_i32_13 : i32
    scf.if %27 {
      %c0_15 = arith.constant 0 : index
      %c0_16 = arith.constant 0 : index
      %30 = vector.load %arg7[%c0_15, %c0_16] : memref<16x32xf32, #tpu.memory_space<vmem>>, vector<16x32xf32>
      %31 = arith.addf %30, %22 : vector<16x32xf32>
      %c0_17 = arith.constant 0 : index
      %c0_18 = arith.constant 0 : index
      %32 = vector.load %arg7[%c0_17, %c0_18] : memref<16x32xf32, #tpu.memory_space<vmem>>, vector<16x32xf32>
      tpu.vector_store %arg7[%c0_17, %c0_18], %31 {strides = array<i32>} : memref<16x32xf32, #tpu.memory_space<vmem>>, vector<16x32xf32>,
    } else {
    }
    %28 = arith.extui %5 : i1 to i32
    %c0_i32_14 = arith.constant 0 : i32
    %29 = arith.cmpi ne, %28, %c0_i32_14 : i32
    scf.if %29 {
      %c0_15 = arith.constant 0 : index
      %c0_16 = arith.constant 0 : index
      %30 = vector.load %arg7[%c0_15, %c0_16] : memref<16x32xf32, #tpu.memory_space<vmem>>, vector<16x32xf32>
      %31 = arith.truncf %30 : vector<16x32xf32> to vector<16x32xbf16>
      %c0_17 = arith.constant 0 : index
      %c0_18 = arith.constant 0 : index
      %32 = vector.load %arg6[%c0_17, %c0_18] : memref<16x32xbf16, #tpu.memory_space<vmem>>, vector<16x32xbf16>
      tpu.vector_store %arg6[%c0_17, %c0_18], %31 {strides = array<i32>} : memref<16x32xbf16, #tpu.memory_space<vmem>>, vector<16x32xbf16>,
    } else {
    }
    return
  }
  func.func @transform_0(%arg0: i32, %arg1: i32, %arg2: i32) -> (i32, i32) {
    %c0_i32 = arith.constant 0 : i32
    %c0_i32_0 = arith.constant 0 : i32
    return %arg0, %c0_i32 : i32, i32
  }
  func.func @transform_1(%arg0: i32, %arg1: i32, %arg2: i32) -> (i32, i32, i32) {
    %c0_i32 = arith.constant 0 : i32
    %c0_i32_0 = arith.constant 0 : i32
    return %arg1, %c0_i32, %arg2 : i32, i32, i32
  }
  func.func @transform_2(%arg0: i32, %arg1: i32, %arg2: i32) -> (i32, i32, i32) {
    %c0_i32 = arith.constant 0 : i32
    %c0_i32_0 = arith.constant 0 : i32
    return %arg1, %arg2, %c0_i32 : i32, i32, i32
  }
  func.func @transform_3(%arg0: i32, %arg1: i32, %arg2: i32) -> (i32, i32) {
    %c0_i32 = arith.constant 0 : i32
    %c0_i32_0 = arith.constant 0 : i32
    return %arg0, %c0_i32 : i32, i32
  }
}

</mosaic_0001>

<bundles_post_ra>
// kernel: tpu_custom_call.1
= control target key start
LH: loop header
LB: loop body
LE: loop exit
PB: predicated region body
PF: predicated region fallthrough
CT: control target
= control target key end

     0   :  { %v317_v1 = vmov 0.0   ;;  %vm318_vm0 = vmmov 0   ;;  %s373_s0 = inlined_call_operand.vmem [shape: bf16[16,32], index: 0, kind: input, shape index: {}]   ;;  %s374_s1 = inlined_call_operand.vmem [shape: bf16[1,32,128], index: 1, kind: input, shape index: {}]   ;;  %s375_s2 = inlined_call_operand.vmem [shape: bf16[1,64,32], index: 2, kind: input, shape index: {}]   ;;  %s376_s3 = inlined_call_operand.hbm [shape: bf16[16,32], index: 3, kind: output, shape index: {}]  }
   0x1   :  { %v280_v0 = vld [vmem:[%s374_s1 + $0x8] sm:$0xff]   ;;  %255 = vmatprep.subr.bf16.mxu0 %v317_v1  ;;  %263 = vmatprep.subr.bf16.mxu1 %v317_v1  ;;  %v281_v2 = vld [vmem:[%s374_s1] sm:$0xff]  }
   0x2   :  { %256 = vmatpush3.bf16.msra.mxu0 %v280_v0  ;;  %259 = vmatprep.mubr.msk.bf16.mxu0 %vm318_vm0, %v317_v1  ;;  %v282_v3 = vld [vmem:[%s373_s0] sm:$0xff]  }
   0x3   :  { %257 = vmatprep.subr.bf16.mxu0 %v317_v1  ;;  %271 = vmatprep.mubr.msk.bf16.mxu1 %vm318_vm0, %v317_v1 }
   0x4   :  { %8 = vsyncpa [#allocation4], 0  ;;  %vm43_vm1 = vcmask 261120   ;;  %v283_v4 = vld [vmem:[%s375_s2 + $0x18] sm:$0xff]   ;;  %v284_v5 = vld [vmem:[%s375_s2 + $0x10] sm:$0xff]   ;;  %s319_s24 = smov 64  }
   0x5   :  { %264 = vmatpush3.bf16.msra.mxu1 %v283_v4  ;;  %v285_v6 = vld [vmem:[%s375_s2 + $0x8] sm:$0xff]   ;;  %v286_v7 = vld [vmem:[%s375_s2] sm:$0xff]   ;;  %vm145_vm2 = vcmask 523264   ;;  %vm204_vm3 = vcmask 257024   ;;  %s320_s2 = smov [#allocation3]  }
   0x6   :  { %258 = vmatpush3.bf16.msra.mxu0 %v281_v2  ;;  %265 = vmatprep.subr.bf16.mxu1 %v317_v1  ;;  %s221_s25 = sshll.u32 %s320_s2, 4  ;;  %s222_s25 = int_to_ptr.vmem [resolvable:$true] %s221_s25 }
   0x7   :  { %s295_s26 = scalar_lea.vmem %s222_s25, 128  ;;  %p300_p1 = scmp.lt.s32.totalorder %s222_s25, %s222_s25 }
   0x8   :  { %p296_p0 = scmp.ne.s32.totalorder %s222_s25, %s295_s26  ;;  %p301_p2 = scmp.lt.s32.totalorder %s295_s26, %s295_s26 }
   0x9   :  { %260 = vmatmul.mubr.msk.bf16.vlgmr.msra.gmra.mxu0 %vm43_vm1, %v282_v3  ;;  %266 = vmatpush3.bf16.msra.mxu1 %v284_v5 }
   0xa   :  { %267 = vmatprep.subr.bf16.mxu1 %v317_v1  ;;  %p302_p3 = por %p301_p2, %p300_p1 }
   0xc   :  { %p303_p4 = pnand %p302_p3, %p296_p0 }
   0xd   :  { %268 = vmatpush3.bf16.msra.mxu1 %v285_v6 }
   0xe   :  { %269 = vmatprep.subr.bf16.mxu1 %v317_v1 }
  0x11   :  { %270 = vmatpush3.bf16.msra.mxu1 %v286_v7 }
  0xc9   :  { %v81_v8 = vpop.f32.mrf.mxu0 }
  0xca   :  { %104 = vrot.lane.b32.xlu0 %v81_v8, %s319_s24  ;;  %v236_v12 = vmul.f32 -1.442695, %v81_v8 }
  0xcb   :  { %v261_v9 = vpop.f32.mrf.mxu0 }
  0xcc   :  { %287 = vpow2.f32 %v236_v12 }
  0xcd   :  { %v84_v10 = vpop.f32.mrf.mxu0 }
  0xce   :  { %106 = vrot.lane.b32.xlu0 %v84_v10, %s319_s24  ;;  %v237_v13 = vmul.f32 -1.442695, %v84_v10 }
  0xcf   :  { %v262_v11 = vpop.f32.mrf.mxu0 }
  0xd0   :  { %289 = vpow2.f32 %v237_v13 }
  0xd9   :  { %v288_v14 = vpop.eup %287 }
  0xda   :  { %v94_v16 = vadd.f32 1.0, %v288_v14 }
  0xdc   :  { %291 = vrcp.f32 %v94_v16 }
  0xdd   :  { %v290_v15 = vpop.eup %289 }
  0xde   :  { %v95_v17 = vadd.f32 1.0, %v290_v15 }
  0xe0   :  { %293 = vrcp.f32 %v95_v17 }
  0xe9   :  { %v292_v18 = vpop.eup %291 }
  0xea   :  { %v100_v21 = vmul.f32 %v292_v18, %v81_v8 }
  0xed   :  { %v294_v19 = vpop.eup %293 }
  0xee   :  { %v101_v22 = vmul.f32 %v294_v19, %v84_v10 }
 0x13c   :  { %v105_v20 = vpop.permute.xlu0 %104 }
 0x13d   :  { %v110_v24 = vmul.f32 %v105_v20, %v100_v21 }
 0x140   :  { %v107_v23 = vpop.permute.xlu0 %106 }
 0x141   :  { %v111_v25 = vmul.f32 %v107_v23, %v101_v22 }
 0x143   :  { %v112_v26 = vpack.c.bf16 %v111_v25, %v110_v24 }
 0x145   :  { %272 = vmatmul.mubr.msk.bf16.vlgmr.msra.gmra.mxu1 %vm145_vm2, %v112_v26 }
 0x205   :  { %v183_v27 = vpop.f32.mrf.mxu1 }
 0x206   :  { %192 = vst.msk [vmem:[#allocation2] sm:$0xff] %vm43_vm1, %v183_v27 }
 0x207   :  { %v273_v28 = vpop.f32.mrf.mxu1 }
 0x209   :  { %v186_v29 = vpop.f32.mrf.mxu1 }
 0x20a   :  { %193 = vst.msk [vmem:[#allocation2 + $0x8] sm:$0xff] %vm43_vm1, %v186_v29 }
 0x20b   :  { %v274_v30 = vpop.f32.mrf.mxu1 }
 0x20d   :  { %v194_v31 = vld [vmem:[#allocation2] sm:$0xff] }
 0x20e   :  { %v245_v32 = vpack.c.bf16 %v194_v31, %v194_v31 }
 0x210   :  { %205 = vst.msk [vmem:[#allocation3] sm:$0xf] %vm204_vm3, %v245_v32 }
 0x211   :  { %v195_v33 = vld [vmem:[#allocation2 + $0x8] sm:$0xff] }
 0x212   :  { %v246_v34 = vpack.c.bf16 %v195_v33, %v195_v33 }
 0x214   :  { %206 = vst.msk [vmem:[#allocation3 + $0x4] sm:$0xf] %vm204_vm3, %v246_v34 }
 0x215   :  { %306 = shalt.err (!%p303_p4)
}
 0x216   :  { %s321_s27 = smov 4  }
 0x217   :  { %227 = dma.vmem_to_hbm [thread:$0]  %s222_s25, 128, %s376_s3, [#allocation4], %s319_s24, %s319_s24, %s321_s27  }
 0x218   :  { %315 = dma.done.wait [#allocation4], 128  }
 0x219   :  { %316 = vsyncadd [#allocation4], 4294967168 }
 0x21a   :  { %231 = vsyncpa [#allocation4], 1 }

</bundles_post_ra>
